<compile_context>
chip_gen: v7x
topology: tpu7x:2x2x1
jax: 0.10.0
libtpu: 0.0.40
codegen_flags: <defaults>
</compile_context>

<pallas_src>
import jax
import jax.numpy as jnp
from jax.experimental import pallas as pl
from jax.experimental.pallas import tpu as pltpu

D_IN, D_H1, D_H2, D_OUT = 28 * 28, 128, 64, 10


def mlp_kernel(x_ref, w1_ref, b1_ref, w2_ref, b2_ref, w3_ref, b3_ref, o_ref):
    # x arrives f32 from HBM; cast to bf16 in VMEM for the MXU (f32 accumulate,
    # f32 bias + ReLU).
    x = x_ref[...].astype(jnp.bfloat16)
    # fc1 + ReLU
    h1 = jnp.dot(x, w1_ref[...], preferred_element_type=jnp.float32)
    h1 = jnp.maximum(h1 + b1_ref[...], 0.0)
    # fc2 + ReLU
    h2 = jnp.dot(h1.astype(jnp.bfloat16), w2_ref[...],
                 preferred_element_type=jnp.float32)
    h2 = jnp.maximum(h2 + b2_ref[...], 0.0)
    # fc3 (logits, no activation)
    out = jnp.dot(h2.astype(jnp.bfloat16), w3_ref[...],
                  preferred_element_type=jnp.float32)
    o_ref[...] = (out + b3_ref[...]).astype(o_ref.dtype)


def _round_up(n, m):
    return (n + m - 1) // m * m


def _default_tm():
    # v7x HBM (~3.2 TB/s) makes the per-tile DMA short, so use a larger tile
    # to amortize the ~0.35 us per-step overhead; 2048 elsewhere (v5e/v6e).
    try:
        kind = jax.devices()[0].device_kind.lower()
        if "v7" in kind:
            return 4096
    except Exception:
        pass
    return 2048


def _resident_spec(shape):
    # Constant block index -> the operand stays resident in VMEM across all
    # grid steps. Single-buffer it (no point double-buffering a block whose
    # index never changes). Fall back if this JAX lacks pipeline_mode/Buffered.
    index_map = lambda i: (0,) * len(shape)
    if hasattr(pl, "Buffered"):
        try:
            return pl.BlockSpec(shape, index_map, pipeline_mode=pl.Buffered(1))
        except TypeError:
            pass
    return pl.BlockSpec(shape, index_map)


def pack_params(params):
    """One-time bf16 cast of the weights (do this OUTSIDE the per-call path).

    Biases stay f32 (accumulation / bias / ReLU are f32 in the kernel)."""
    w1, b1, w2, b2, w3, b3 = params
    return (w1.astype(jnp.bfloat16), b1,
            w2.astype(jnp.bfloat16), b2,
            w3.astype(jnp.bfloat16), b3)


def mlp_forward(x_nchw, packed_params, *, tm=None):
    """x_nchw: (B, 1, 28, 28) f32. packed_params from pack_params().

    Returns (B, 10) f32 logits."""
    w1b, b1, w2b, b2, w3b, b3 = packed_params
    B = x_nchw.shape[0]
    x = x_nchw.reshape(B, D_IN)               # x.view(-1, 784); stays f32 in HBM

    if tm is None:
        tm = _default_tm()
    # Tile stays a multiple of 8 sublanes (x is f32 in HBM; 8 is enough for
    # f32) and doesn't over-allocate for tiny batches. No padding of x:
    # Pallas masks the partial tail block (garbage tail rows are row
    # independent; OOB output rows are never written back).
    tm = min(tm, _round_up(B, 8))
    grid = (pl.cdiv(B, tm),)

    wbytes = (D_IN * D_H1 + D_H1 * D_H2 + D_H2 * D_OUT) * 2 \
             + (D_H1 + D_H2 + D_OUT) * 4
    cost = pl.CostEstimate(
        flops=2 * B * (D_IN * D_H1 + D_H1 * D_H2 + D_H2 * D_OUT),
        transcendentals=0,
        bytes_accessed=B * D_IN * 4 + B * D_OUT * 4 + wbytes,
    )

    return pl.pallas_call(
        mlp_kernel,
        out_shape=jax.ShapeDtypeStruct((B, D_OUT), jnp.float32),
        grid=grid,
        in_specs=[
            pl.BlockSpec((tm, D_IN), lambda i: (i, 0)),   # x: batch-tiled, pipelined
            _resident_spec(w1b.shape), _resident_spec(b1.shape),
            _resident_spec(w2b.shape), _resident_spec(b2.shape),
            _resident_spec(w3b.shape), _resident_spec(b3.shape),
        ],
        out_specs=pl.BlockSpec((tm, D_OUT), lambda i: (i, 0)),
        compiler_params=pltpu.CompilerParams(
            dimension_semantics=("parallel",),   # batch axis shards across v7x's 2 TCs
            vmem_limit_bytes=48 << 20,           # >=16 MiB headroom on v7x's 64 MiB/TC
        ),
        cost_estimate=cost,
    )(x, w1b, b1, w2b, b2, w3b, b3)


def init_params(key):
    """Deterministic init mirroring nn.Linear shapes (stored transposed), f32."""
    dims = [(D_IN, D_H1), (D_H1, D_H2), (D_H2, D_OUT)]
    params = []
    for i, (fan_in, fan_out) in enumerate(dims):
        kw, kb, key = jax.random.split(jax.random.fold_in(key, i), 3)
        bound = 1.0 / (fan_in ** 0.5)   # PyTorch default U(-1/sqrt(fan_in), +)
        w = jax.random.uniform(kw, (fan_in, fan_out), jnp.float32, -bound, bound)
        b = jax.random.uniform(kb, (1, fan_out), jnp.float32, -bound, bound)
        params.extend([w, b])
    return tuple(params)


def mlp_reference(x_nchw, params):
    """Pure-JAX reference using the same bf16-operand / f32-accumulate recipe."""
    w1, b1, w2, b2, w3, b3 = params
    x = x_nchw.reshape(x_nchw.shape[0], D_IN).astype(jnp.bfloat16)
    h1 = jnp.maximum(
        jnp.dot(x, w1.astype(jnp.bfloat16), preferred_element_type=jnp.float32)
        + b1, 0.0)
    h2 = jnp.maximum(
        jnp.dot(h1.astype(jnp.bfloat16), w2.astype(jnp.bfloat16),
                preferred_element_type=jnp.float32) + b2, 0.0)
    return jnp.dot(h2.astype(jnp.bfloat16), w3.astype(jnp.bfloat16),
                   preferred_element_type=jnp.float32) + b3


if __name__ == "__main__":
    key = jax.random.PRNGKey(0)
    kx, kp = jax.random.split(key)

    params = init_params(kp)
    packed = pack_params(params)   # bf16 weight cast happens once, not per call

    # Small batch (B=2 < 8): exercises the single partial block path.
    B = 2
    x = jax.random.normal(kx, (B, 1, 28, 28), dtype=jnp.float32)  # NCHW input
    out = jax.block_until_ready(mlp_forward(x, packed))
    ref = mlp_reference(x, params)
    assert out.shape == (B, 10)
    assert jnp.allclose(out, ref, atol=2e-2, rtol=2e-2)

    # Ragged multi-block path (B not a multiple of tm): 4 grid steps, the last
    # one partial -- verifies the no-pad tail handling called out in review.
    B2 = 50
    x2 = jax.random.normal(jax.random.fold_in(kx, 1), (B2, 1, 28, 28),
                           dtype=jnp.float32)
    out2 = jax.block_until_ready(mlp_forward(x2, packed, tm=16))
    ref2 = mlp_reference(x2, params)
    assert out2.shape == (B2, 10)
    assert jnp.allclose(out2, ref2, atol=2e-2, rtol=2e-2)

    print("KERNEL_OK")
</pallas_src>

<mosaic_0001>
module attributes {stable_mosaic.version = 11 : i64} {
  func.func @mlp_kernel(%arg0: i32, %arg1: memref<8x784xf32, #tpu.memory_space<vmem>>, %arg2: memref<784x128xbf16, #tpu.memory_space<vmem>>, %arg3: memref<1x128xf32, #tpu.memory_space<vmem>>, %arg4: memref<128x64xbf16, #tpu.memory_space<vmem>>, %arg5: memref<1x64xf32, #tpu.memory_space<vmem>>, %arg6: memref<64x10xbf16, #tpu.memory_space<vmem>>, %arg7: memref<1x10xf32, #tpu.memory_space<vmem>>, %arg8: memref<8x10xf32, #tpu.memory_space<vmem>>) attributes {dimension_semantics = [#tpu.dimension_semantics<parallel>], iteration_bounds = array<i64: 1>, scalar_prefetch = 0 : i64, scratch_operands = 0 : i64, tpu.core_type = #tpu.core_type<tc>, window_params = [{transform_indices = @transform_0, window_bounds = array<i64: 8, 784>}, {pipeline_mode = #tpu.pipeline_mode<synchronous>, transform_indices = @transform_1, window_bounds = array<i64: 784, 128>}, {pipeline_mode = #tpu.pipeline_mode<synchronous>, transform_indices = @transform_2, window_bounds = array<i64: 1, 128>}, {pipeline_mode = #tpu.pipeline_mode<synchronous>, transform_indices = @transform_3, window_bounds = array<i64: 128, 64>}, {pipeline_mode = #tpu.pipeline_mode<synchronous>, transform_indices = @transform_4, window_bounds = array<i64: 1, 64>}, {pipeline_mode = #tpu.pipeline_mode<synchronous>, transform_indices = @transform_5, window_bounds = array<i64: 64, 10>}, {pipeline_mode = #tpu.pipeline_mode<synchronous>, transform_indices = @transform_6, window_bounds = array<i64: 1, 10>}, {transform_indices = @transform_7, window_bounds = array<i64: 8, 10>}]} {
    %c0 = arith.constant 0 : index
    %c0_0 = arith.constant 0 : index
    %0 = vector.load %arg1[%c0, %c0_0] : memref<8x784xf32, #tpu.memory_space<vmem>>, vector<8x784xf32>
    %1 = arith.truncf %0 : vector<8x784xf32> to vector<8x784xbf16>
    %c0_1 = arith.constant 0 : index
    %c0_2 = arith.constant 0 : index
    %2 = vector.load %arg2[%c0_1, %c0_2] : memref<784x128xbf16, #tpu.memory_space<vmem>>, vector<784x128xbf16>
    %cst = arith.constant dense<0.000000e+00> : vector<8x128xf32>
    %3 = tpu.matmul %1, %2, %cst {dimension_numbers = #tpu.dot_dimension_numbers<[1], [0], [0], [1], [0, 0, 1, 1], [], []>} : vector<8x784xbf16>, vector<784x128xbf16>, vector<8x128xf32> -> vector<8x128xf32>
    %c0_3 = arith.constant 0 : index
    %c0_4 = arith.constant 0 : index
    %4 = vector.load %arg3[%c0_3, %c0_4] : memref<1x128xf32, #tpu.memory_space<vmem>>, vector<1x128xf32>
    %5 = vector.broadcast %4 : vector<1x128xf32> to vector<8x128xf32>
    %6 = arith.addf %3, %5 : vector<8x128xf32>
    %cst_5 = arith.constant 0.000000e+00 : f32
    %7 = vector.broadcast %cst_5 : f32 to vector<8x128xf32>
    %8 = arith.maximumf %6, %7 : vector<8x128xf32>
    %9 = arith.truncf %8 : vector<8x128xf32> to vector<8x128xbf16>
    %c0_6 = arith.constant 0 : index
    %c0_7 = arith.constant 0 : index
    %10 = vector.load %arg4[%c0_6, %c0_7] : memref<128x64xbf16, #tpu.memory_space<vmem>>, vector<128x64xbf16>
    %cst_8 = arith.constant dense<0.000000e+00> : vector<8x64xf32>
    %11 = tpu.matmul %9, %10, %cst_8 {dimension_numbers = #tpu.dot_dimension_numbers<[1], [0], [0], [1], [0, 0, 1, 1], [], []>} : vector<8x128xbf16>, vector<128x64xbf16>, vector<8x64xf32> -> vector<8x64xf32>
    %c0_9 = arith.constant 0 : index
    %c0_10 = arith.constant 0 : index
    %12 = vector.load %arg5[%c0_9, %c0_10] : memref<1x64xf32, #tpu.memory_space<vmem>>, vector<1x64xf32>
    %13 = vector.broadcast %12 : vector<1x64xf32> to vector<8x64xf32>
    %14 = arith.addf %11, %13 : vector<8x64xf32>
    %cst_11 = arith.constant 0.000000e+00 : f32
    %15 = vector.broadcast %cst_11 : f32 to vector<8x64xf32>
    %16 = arith.maximumf %14, %15 : vector<8x64xf32>
    %17 = arith.truncf %16 : vector<8x64xf32> to vector<8x64xbf16>
    %c0_12 = arith.constant 0 : index
    %c0_13 = arith.constant 0 : index
    %18 = vector.load %arg6[%c0_12, %c0_13] : memref<64x10xbf16, #tpu.memory_space<vmem>>, vector<64x10xbf16>
    %cst_14 = arith.constant dense<0.000000e+00> : vector<8x10xf32>
    %19 = tpu.matmul %17, %18, %cst_14 {dimension_numbers = #tpu.dot_dimension_numbers<[1], [0], [0], [1], [0, 0, 1, 1], [], []>} : vector<8x64xbf16>, vector<64x10xbf16>, vector<8x10xf32> -> vector<8x10xf32>
    %c0_15 = arith.constant 0 : index
    %c0_16 = arith.constant 0 : index
    %20 = vector.load %arg7[%c0_15, %c0_16] : memref<1x10xf32, #tpu.memory_space<vmem>>, vector<1x10xf32>
    %21 = vector.broadcast %20 : vector<1x10xf32> to vector<8x10xf32>
    %22 = arith.addf %19, %21 : vector<8x10xf32>
    %c0_17 = arith.constant 0 : index
    %c0_18 = arith.constant 0 : index
    %23 = vector.load %arg8[%c0_17, %c0_18] : memref<8x10xf32, #tpu.memory_space<vmem>>, vector<8x10xf32>
    tpu.vector_store %arg8[%c0_17, %c0_18], %22 {strides = array<i32>} : memref<8x10xf32, #tpu.memory_space<vmem>>, vector<8x10xf32>,
    return
  }
  func.func @transform_0(%arg0: i32) -> (i32, i32) {
    %c0_i32 = arith.constant 0 : i32
    %c0_i32_0 = arith.constant 0 : i32
    return %arg0, %c0_i32 : i32, i32
  }
  func.func @transform_1(%arg0: i32) -> (i32, i32) {
    %c0_i32 = arith.constant 0 : i32
    %c0_i32_0 = arith.constant 0 : i32
    %c0_i32_1 = arith.constant 0 : i32
    return %c0_i32, %c0_i32_0 : i32, i32
  }
  func.func @transform_2(%arg0: i32) -> (i32, i32) {
    %c0_i32 = arith.constant 0 : i32
    %c0_i32_0 = arith.constant 0 : i32
    %c0_i32_1 = arith.constant 0 : i32
    return %c0_i32, %c0_i32_0 : i32, i32
  }
  func.func @transform_3(%arg0: i32) -> (i32, i32) {
    %c0_i32 = arith.constant 0 : i32
    %c0_i32_0 = arith.constant 0 : i32
    %c0_i32_1 = arith.constant 0 : i32
    return %c0_i32, %c0_i32_0 : i32, i32
  }
  func.func @transform_4(%arg0: i32) -> (i32, i32) {
    %c0_i32 = arith.constant 0 : i32
    %c0_i32_0 = arith.constant 0 : i32
    %c0_i32_1 = arith.constant 0 : i32
    return %c0_i32, %c0_i32_0 : i32, i32
  }
  func.func @transform_5(%arg0: i32) -> (i32, i32) {
    %c0_i32 = arith.constant 0 : i32
    %c0_i32_0 = arith.constant 0 : i32
    %c0_i32_1 = arith.constant 0 : i32
    return %c0_i32, %c0_i32_0 : i32, i32
  }
  func.func @transform_6(%arg0: i32) -> (i32, i32) {
    %c0_i32 = arith.constant 0 : i32
    %c0_i32_0 = arith.constant 0 : i32
    %c0_i32_1 = arith.constant 0 : i32
    return %c0_i32, %c0_i32_0 : i32, i32
  }
  func.func @transform_7(%arg0: i32) -> (i32, i32) {
    %c0_i32 = arith.constant 0 : i32
    %c0_i32_0 = arith.constant 0 : i32
    return %arg0, %c0_i32 : i32, i32
  }
}

</mosaic_0001>

<bundles_post_ra>
// kernel: tpu_custom_call.1
= control target key start
LH: loop header
LB: loop body
LE: loop exit
PB: predicated region body
PF: predicated region fallthrough
CT: control target
= control target key end

     0   :  { %12 = vsyncpa [#allocation3], 0  ;;  %s1411_s0 = inlined_call_operand.vmem [shape: f32[2,784], index: 0, kind: input, shape index: {}]   ;;  %s1412_s1 = inlined_call_operand.hbm [shape: bf16[784,128], index: 1, kind: input, shape index: {}]   ;;  %s1413_s2 = inlined_call_operand.vmem [shape: f32[1,128], index: 2, kind: input, shape index: {}]   ;;  %s1414_s3 = inlined_call_operand.vmem [shape: bf16[128,64], index: 3, kind: input, shape index: {}]   ;;  %s1415_s4 = inlined_call_operand.vmem [shape: f32[1,64], index: 4, kind: input, shape index: {}]   ;;  %s1416_s5 = inlined_call_operand.vmem [shape: bf16[64,10], index: 5, kind: input, shape index: {}]   ;;  %s1417_s6 = inlined_call_operand.vmem [shape: f32[1,10], index: 6, kind: input, shape index: {}]   ;;  %s1418_s7 = inlined_call_operand.hbm [shape: f32[2,10], index: 7, kind: output, shape index: {}]  }
   0x1   :  { %13 = vsyncpa [#allocation4], 0  ;;  %s1239_s24 = smov [#allocation2]   ;;  %s1191_s28 = scalar_lea.hbm %s1412_s1, 6272 }
   0x2   :  { %s21_s25 = sshll.u32 %s1239_s24, 4  ;;  %p1192_p0 = scmp.ne.s32.totalorder %s1412_s1, %s1191_s28  ;;  %s22_s25 = int_to_ptr.vmem [resolvable:$true] %s21_s25 }
   0x3   :  { %p1195_p1 = scmp.lt.u32.totalorder %s1191_s28, %s1412_s1 }
   0x5   :  { %p1197_p2 = pnand %p1195_p1, %p1192_p0 }
   0x7   :  { %1200 = shalt.err (!%p1197_p2)
}
   0x8   :  { %s1201_s10 = scalar_lea.vmem %s22_s25, 6272  ;;  %p1206_p4 = scmp.lt.s32.totalorder %s22_s25, %s22_s25 }
   0x9   :  { %p1202_p3 = scmp.ne.s32.totalorder %s22_s25, %s1201_s10  ;;  %p1207_p5 = scmp.lt.s32.totalorder %s1201_s10, %s1201_s10 }
   0xb   :  { %p1208_p6 = por %p1207_p5, %p1206_p4 }
   0xd   :  { %p1209_p7 = pnand %p1208_p6, %p1202_p3 }
   0xf   :  { %1212 = shalt.err (!%p1209_p7)
}
  0x10   :  { %s1240_s11 = smov 64   ;;  %s1241_s12 = smov 4  }
  0x11   :  { %27 = dma.hbm_to_vmem [thread:$0]  %s1412_s1, 6272, %s22_s25, [#allocation3], %s1240_s11, %s1240_s11, %s1241_s12  }
  0x12   :  { %1235 = dma.done.wait [#allocation3], 6272  }
  0x13   :  { %1236 = vsyncadd [#allocation3], 4294961024  ;;  %v1118_v0 = vld [vmem:[#allocation2 + $0x40] sm:$0xff]   ;;  %v1122_v4 = vld [vmem:[#allocation2 + $0x48] sm:$0xff]   ;;  %v1242_v23 = vmov 1983009808   ;;  %v65_v25 = vlaneseq }
  0x14   :  { %v1119_v1 = vld [vmem:[#allocation2] sm:$0xff]   ;;  %989 = vmatprep.subr.bf16.mxu0 %v1118_v0  ;;  %v1123_v5 = vld [vmem:[#allocation2 + $0x8] sm:$0xff]   ;;  %v1126_v8 = vld [vmem:[#allocation2 + $0x50] sm:$0xff]   ;;  %v63_v24 = vunpack.c.l.s4 %v1242_v23  ;;  %v1243_v47 = vmov 0.0   ;;  %vm1244_vm0 = vmmov 0   ;;  %vm542_vm1 = vcmask 130048  }
  0x15   :  { %v1120_v2 = vld [vmem:[#allocation2 + $0xc0] sm:$0xff]   ;;  %990 = vmatpush3.bf16.msra.mxu0 %v1119_v1  ;;  %v1124_v6 = vld [vmem:[#allocation2 + $0xc8] sm:$0xff]   ;;  %v1127_v9 = vld [vmem:[#allocation2 + $0x10] sm:$0xff]   ;;  %v66_v31 = vshrl.u32 %v65_v25, 7  ;;  %vm860_vm2 = vcmask 523264   ;;  %vm904_vm3 = vcmask 80896  }
  0x16   :  { %v1121_v3 = vld [vmem:[#allocation2 + $0x80] sm:$0xff]   ;;  %1011 = vmatprep.subr.bf16.mxu1 %v1120_v2  ;;  %991 = vmatprep.subr.bf16.mxu0 %v1122_v4  ;;  %v1125_v7 = vld [vmem:[#allocation2 + $0x88] sm:$0xff]   ;;  %v1128_v10 = vld [vmem:[#allocation2 + $0xd0] sm:$0xff]   ;;  %v64_v30 = vunpack.c.0.s8 %v63_v24 }
  0x17   :  { %1012 = vmatpush3.bf16.msra.mxu1 %v1121_v3  ;;  %v1129_v11 = vld [vmem:[#allocation2 + $0x90] sm:$0xff]   ;;  %v1130_v12 = vld [vmem:[#allocation2 + $0x58] sm:$0xff]   ;;  %v1134_v16 = vld [vmem:[#allocation2 + $0x60] sm:$0xff]  }
  0x18   :  { %1013 = vmatprep.subr.bf16.mxu1 %v1124_v6  ;;  %v1131_v13 = vld [vmem:[#allocation2 + $0x18] sm:$0xff]   ;;  %v1135_v17 = vld [vmem:[#allocation2 + $0x20] sm:$0xff]   ;;  %v1138_v20 = vld [vmem:[#allocation2 + $0x68] sm:$0xff]   ;;  %v1300_v36 = vsub.s32 %v64_v30, %v66_v31 }
  0x19   :  { %992 = vmatpush3.bf16.msra.mxu0 %v1123_v5  ;;  %v1132_v14 = vld [vmem:[#allocation2 + $0xd8] sm:$0xff]   ;;  %v1136_v18 = vld [vmem:[#allocation2 + $0xe0] sm:$0xff]   ;;  %v1139_v21 = vld [vmem:[#allocation2 + $0x28] sm:$0xff]  }
  0x1a   :  { %993 = vmatprep.subr.bf16.mxu0 %v1126_v8  ;;  %v1133_v15 = vld [vmem:[#allocation2 + $0x98] sm:$0xff]   ;;  %v1137_v19 = vld [vmem:[#allocation2 + $0xa0] sm:$0xff]   ;;  %v1140_v22 = vld [vmem:[#allocation2 + $0xe8] sm:$0xff]  }
  0x1b   :  { %1014 = vmatpush3.bf16.msra.mxu1 %v1125_v7  ;;  %v1141_v26 = vld [vmem:[#allocation2 + $0xa8] sm:$0xff]   ;;  %v1142_v27 = vld [vmem:[#allocation2 + $0x70] sm:$0xff]   ;;  %v1146_v33 = vld [vmem:[#allocation2 + $0x78] sm:$0xff]  }
  0x1c   :  { %1015 = vmatprep.subr.bf16.mxu1 %v1128_v10  ;;  %v1143_v28 = vld [vmem:[#allocation2 + $0x30] sm:$0xff]   ;;  %v1147_v34 = vld [vmem:[#allocation2 + $0x38] sm:$0xff]   ;;  %v1154_v42 = vld [vmem:[#allocation2 + $0x140] sm:$0xff]  }
  0x1d   :  { %994 = vmatpush3.bf16.msra.mxu0 %v1127_v9  ;;  %v1144_v29 = vld [vmem:[#allocation2 + $0xf0] sm:$0xff]   ;;  %v1148_v35 = vld [vmem:[#allocation2 + $0xf8] sm:$0xff]   ;;  %v1157_v52 = vld [vmem:[#allocation2 + $0x100] sm:$0xff]  }
  0x1e   :  { %995 = vmatprep.subr.bf16.mxu0 %v1130_v12  ;;  %v1145_v32 = vld [vmem:[#allocation2 + $0xb0] sm:$0xff]   ;;  %v1151_v38 = vld [vmem:[%s1411_s0 + $0x1c] ss:$14 sps:$4 sm:$0xff]   ;;  %v1164_v63 = vld [vmem:[#allocation2 + $0x160] sm:$0xff]  }
  0x1f   :  { %1016 = vmatpush3.bf16.msra.mxu1 %v1129_v11  ;;  %v1149_v37 = vld [vmem:[%s1411_s0] ss:$14 sps:$4 sm:$0xff]   ;;  %v1153_v39 = vld [vmem:[#allocation2 + $0xb8] sm:$0xff]   ;;  %v82_v41 = vrot.slane %v1151_v38, %v1300_v36  ;;  %v1155_v43 = vld [vmem:[%s1411_s0 + $0x4] ss:$14 sps:$4 sm:$0xff]  }
  0x20   :  { %1017 = vmatprep.subr.bf16.mxu1 %v1132_v14  ;;  %v68_v40 = vrot.slane %v1149_v37, %v1300_v36  ;;  %v1156_v44 = vld [vmem:[%s1411_s0 + $0x20] ss:$14 sps:$4 sm:$0xff]   ;;  %v75_v48 = vrot.slane %v1155_v43, %v1300_v36  ;;  %v1162_v61 = vld [vmem:[#allocation2 + $0x158] sm:$0xff]   ;;  %v1176_v5 = vld [vmem:[%s1411_s0 + $0x24] ss:$14 sps:$4 sm:$0xff]  }
  0x21   :  { %996 = vmatpush3.bf16.msra.mxu0 %v1131_v13  ;;  %v89_v49 = vrot.slane %v1156_v44, %v1300_v36  ;;  %v1158_v55 = vld [vmem:[#allocation2 + $0x148] sm:$0xff]   ;;  %v1160_v59 = vld [vmem:[#allocation2 + $0x150] sm:$0xff]   ;;  %v1163_v62 = vld [vmem:[#allocation2 + $0x118] sm:$0xff]   ;;  %v118_v10 = vrot.slane %v1176_v5, %v1300_v36 }
  0x22   :  { %997 = vmatprep.subr.bf16.mxu0 %v1134_v16  ;;  %v91_v45 = vcombine.high %v68_v40, %v82_v41  ;;  %v90_v46 = vcombine.low %v68_v40, %v82_v41  ;;  %v1159_v58 = vld [vmem:[#allocation2 + $0x108] sm:$0xff]   ;;  %v1161_v60 = vld [vmem:[#allocation2 + $0x110] sm:$0xff]   ;;  %v1172_v0 = vld [vmem:[#allocation2 + $0x180] sm:$0xff]  }
  0x23   :  { %1018 = vmatpush3.bf16.msra.mxu1 %v1133_v15  ;;  %v93_v53 = vcombine.high %v75_v48, %v89_v49  ;;  %v92_v54 = vcombine.low %v75_v48, %v89_v49  ;;  %v1165_v1 = vld [vmem:[#allocation2 + $0x120] sm:$0xff]   ;;  %v1173_v2 = vld [vmem:[%s1411_s0 + $0x8] ss:$14 sps:$4 sm:$0xff]   ;;  %v1175_v3 = vld [vmem:[%s1411_s0 + $0xc] ss:$14 sps:$4 sm:$0x33]  }
  0x24   :  { %1019 = vmatprep.subr.bf16.mxu1 %v1136_v18  ;;  %v137_v50 = vpack.c.bf16 %v91_v45, %v91_v45  ;;  %v136_v51 = vpack.c.bf16 %v90_v46, %v90_v46  ;;  %v1166_v4 = vld [vmem:[#allocation2 + $0x168] sm:$0xff]   ;;  %v104_v7 = vrot.slane %v1173_v2, %v1300_v36  ;;  %v111_v8 = vrot.slane %v1175_v3, %v1300_v36  ;;  %v1168_v12 = vld [vmem:[#allocation2 + $0x170] sm:$0xff]   ;;  %v1170_v18 = vld [vmem:[#allocation2 + $0x178] sm:$0xff]  }
  0x25   :  { %998 = vmatpush3.bf16.msra.mxu0 %v1135_v17  ;;  %v139_v56 = vpack.c.bf16 %v93_v53, %v93_v53  ;;  %v138_v57 = vpack.c.bf16 %v92_v54, %v92_v54  ;;  %v1178_v6 = vld [vmem:[%s1411_s0 + $0x28] ss:$14 sps:$4 sm:$0x33]   ;;  %v1182_v25 = vld [vmem:[%s1414_s3 + $0x18] sm:$0xff]   ;;  %v1187_v30 = vld [vmem:[%s1416_s5] sm:$0xff]  }
  0x26   :  { %999 = vmatprep.subr.bf16.mxu0 %v1138_v20  ;;  %578 = vmatprep.mubr.bf16.mxu0 %v137_v50  ;;  %v1167_v9 = vld [vmem:[#allocation2 + $0x128] sm:$0xff]   ;;  %v125_v11 = vrot.slane %v1178_v6, %v1300_v36  ;;  %v127_v13 = vcombine.high %v104_v7, %v118_v10  ;;  %v1169_v15 = vld [vmem:[#allocation2 + $0x130] sm:$0xff]   ;;  %v1171_v20 = vld [vmem:[#allocation2 + $0x138] sm:$0xff]  }
  0x27   :  { %1020 = vmatpush3.bf16.msra.mxu1 %v1137_v19  ;;  %618 = vmatprep.mubr.bf16.mxu1 %v139_v56  ;;  %v126_v19 = vcombine.low %v104_v7, %v118_v10  ;;  %v1180_v23 = vld [vmem:[%s1414_s3 + $0x8] sm:$0xff]   ;;  %v1181_v24 = vld [vmem:[%s1414_s3 + $0x10] sm:$0xff]  }
  0x28   :  { %1021 = vmatprep.subr.bf16.mxu1 %v1140_v22  ;;  %v128_v14 = vcombine.low %v111_v8, %v125_v11  ;;  %v141_v16 = vpack.c.bf16 %v127_v13, %v127_v13  ;;  %v1179_v22 = vld [vmem:[%s1414_s3] sm:$0xff]   ;;  %v1188_v31 = vld [vmem:[%s1416_s5 + $0x8] sm:$0xff]  }
  0x29   :  { %1000 = vmatpush3.bf16.msra.mxu0 %v1139_v21  ;;  %v140_v21 = vpack.c.bf16 %v126_v19, %v126_v19 }
  0x2a   :  { %1001 = vmatprep.subr.bf16.mxu0 %v1142_v27  ;;  %v142_v17 = vpack.c.bf16 %v128_v14, %v128_v14  ;;  %v1184_v27 = vld [vmem:[%s1414_s3 + $0x28] sm:$0xff]  }
  0x2b   :  { %1022 = vmatpush3.bf16.msra.mxu1 %v1141_v26  ;;  %v1183_v26 = vld [vmem:[%s1414_s3 + $0x20] sm:$0xff]  }
  0x2c   :  { %1023 = vmatprep.subr.bf16.mxu1 %v1144_v29  ;;  %v1186_v29 = vld [vmem:[%s1414_s3 + $0x38] sm:$0xff]  }
  0x2d   :  { %1002 = vmatpush3.bf16.msra.mxu0 %v1143_v28  ;;  %v1185_v28 = vld [vmem:[%s1414_s3 + $0x30] sm:$0xff]  }
  0x2e   :  { %1003 = vmatprep.subr.bf16.mxu0 %v1146_v33  ;;  %v923_v33 = vld [vmem:[%s1413_s2] ss:$0 sm:$0xff] }
  0x2f   :  { %1024 = vmatpush3.bf16.msra.mxu1 %v1145_v32 }
  0x30   :  { %1025 = vmatprep.subr.bf16.mxu1 %v1148_v35 }
  0x31   :  { %1004 = vmatpush3.bf16.msra.mxu0 %v1147_v34 }
  0x32   :  { %1033 = vmatprep.subr.bf16.mxu0 %v1154_v42 }
  0x33   :  { %1026 = vmatpush3.bf16.msra.mxu1 %v1153_v39 }
  0x34   :  { %1071 = vmatprep.subr.bf16.mxu1 %v1243_v47  ;;  %579 = vmatmul.mubr.bf16.vlgmr.msra.gmra.mrb[0].mxu0 %v136_v51 }
  0x35   :  { %1034 = vmatpush3.bf16.msra.mxu0 %v1157_v52  ;;  %658 = vmatprep.mubr.bf16.mxu0 %v141_v16 }
  0x36   :  { %1035 = vmatprep.subr.bf16.mxu0 %v1158_v55  ;;  %619 = vmatmul.mubr.bf16.vlgmr.msra.gmra.mrb[0].mxu1 %v138_v57 }
  0x37   :  { %1073 = vmatprep.mubr.msk.bf16.mxu1 %vm1244_vm0, %v1243_v47  ;;  %1072 = vmatpush3.bf16.msra.mxu1 %v1172_v0 }
  0x38   :  { %1077 = vmatprep.subr.bf16.mxu1 %v1243_v47 }
  0x39   :  { %1036 = vmatpush3.bf16.msra.mxu0 %v1159_v58 }
  0x3a   :  { %1037 = vmatprep.subr.bf16.mxu0 %v1160_v59  ;;  %v1189_v59 = vld [vmem:[%s1416_s5 + $0x10] sm:$0xff]  }
  0x3d   :  { %1038 = vmatpush3.bf16.msra.mxu0 %v1161_v60  ;;  %v1190_v60 = vld [vmem:[%s1416_s5 + $0x18] sm:$0xff]  }
  0x3e   :  { %1039 = vmatprep.subr.bf16.mxu0 %v1162_v61  ;;  %1074 = vmatmul.mubr.msk.bf16.vlgmr.msra.gmra.mrb[4].mxu1 %vm542_vm1, %v142_v17  ;;  %v974_v61 = vld [vmem:[%s1415_s4] ss:$0 sm:$0xff] }
  0x3f   :  { %1093 = vmatprep.mubr.msk.bf16.mxu1 %vm1244_vm0, %v1243_v47  ;;  %1078 = vmatpush3.bf16.msra.mxu1 %v1179_v22 }
  0x40   :  { %1079 = vmatprep.subr.bf16.mxu1 %v1243_v47 }
  0x41   :  { %1040 = vmatpush3.bf16.msra.mxu0 %v1163_v62 }
  0x42   :  { %1041 = vmatprep.subr.bf16.mxu0 %v1164_v63 }
  0x43   :  { %1080 = vmatpush3.bf16.msra.mxu1 %v1180_v23 }
  0x44   :  { %1081 = vmatprep.subr.bf16.mxu1 %v1243_v47 }
  0x45   :  { %1042 = vmatpush3.bf16.msra.mxu0 %v1165_v1 }
  0x46   :  { %1043 = vmatprep.subr.bf16.mxu0 %v1166_v4 }
  0x47   :  { %1082 = vmatpush3.bf16.msra.mxu1 %v1181_v24 }
  0x48   :  { %1083 = vmatprep.subr.bf16.mxu1 %v1243_v47 }
  0x49   :  { %1044 = vmatpush3.bf16.msra.mxu0 %v1167_v9 }
  0x4a   :  { %1045 = vmatprep.subr.bf16.mxu0 %v1168_v12 }
  0x4b   :  { %1084 = vmatpush3.bf16.msra.mxu1 %v1182_v25 }
  0x4c   :  { %1085 = vmatprep.subr.bf16.mxu1 %v1243_v47 }
  0x4d   :  { %1046 = vmatpush3.bf16.msra.mxu0 %v1169_v15 }
  0x4e   :  { %1047 = vmatprep.subr.bf16.mxu0 %v1170_v18 }
  0x4f   :  { %1086 = vmatpush3.bf16.msra.mxu1 %v1183_v26 }
  0x50   :  { %1087 = vmatprep.subr.bf16.mxu1 %v1243_v47 }
  0x51   :  { %1048 = vmatpush3.bf16.msra.mxu0 %v1171_v20 }
  0x52   :  { %1097 = vmatprep.subr.bf16.mxu0 %v1243_v47 }
  0x53   :  { %1088 = vmatpush3.bf16.msra.mxu1 %v1184_v27 }
  0x54   :  { %659 = vmatmul.mubr.bf16.vlgmr.msra.gmra.mrb[4].mxu0 %v140_v21  ;;  %1089 = vmatprep.subr.bf16.mxu1 %v1243_v47 }
  0x55   :  { %1105 = vmatprep.mubr.msk.bf16.mxu0 %vm1244_vm0, %v1243_v47  ;;  %1098 = vmatpush3.bf16.msra.mxu0 %v1187_v30 }
  0x56   :  { %1099 = vmatprep.subr.bf16.mxu0 %v1243_v47 }
  0x57   :  { %1090 = vmatpush3.bf16.msra.mxu1 %v1185_v28 }
  0x58   :  { %1091 = vmatprep.subr.bf16.mxu1 %v1243_v47 }
  0x59   :  { %1100 = vmatpush3.bf16.msra.mxu0 %v1188_v31 }
  0x5a   :  { %1101 = vmatprep.subr.bf16.mxu0 %v1243_v47 }
  0x5b   :  { %1092 = vmatpush3.bf16.msra.mxu1 %v1186_v29 }
  0x5d   :  { %1102 = vmatpush3.bf16.msra.mxu0 %v1189_v59 }
  0x5e   :  { %1103 = vmatprep.subr.bf16.mxu0 %v1243_v47  ;;  %v983_v47 = vld [vmem:[%s1417_s6] ss:$0 sm:$0xff] }
  0x61   :  { %1104 = vmatpush3.bf16.msra.mxu0 %v1190_v60 }
 0x107   :  { %v1005_v32 = vpop.f32.mrb[0].mxu0 }
 0x108   :  { %v1006_v34 = vpop.f32.mrb[1].mxu0 }
 0x109   :  { %v1007_v35 = vadd.f32 %v1006_v34, %v1005_v32  ;;  %v1008_v36 = vpop.f32.mrb[2].mxu0  ;;  %v1027_v37 = vpop.f32.mrb[0].mxu1 }
 0x10a   :  { %v1009_v38 = vpop.f32.mrb[3].mxu0  ;;  %v1028_v40 = vpop.f32.mrb[1].mxu1 }
 0x10b   :  { %v581_v39 = vadd.f32 %v1007_v35, %v923_v33  ;;  %v1029_v41 = vadd.f32 %v1028_v40, %v1027_v37  ;;  %v1030_v42 = vpop.f32.mrb[2].mxu1 }
 0x10c   :  { %v1031_v43 = vpop.f32.mrb[3].mxu1 }
 0x10d   :  { %v621_v44 = vadd.f32 %v1029_v41, %v581_v39 }
 0x111   :  { %v700_v45 = vpop.f32.mrb[4].mxu1 }
 0x112   :  { %v1075_v46 = vpop.f32.mrb[5].mxu1 }
 0x113   :  { %v703_v48 = vpop.f32.mrb[6].mxu1 }
 0x114   :  { %v1076_v49 = vpop.f32.mrb[7].mxu1 }
 0x127   :  { %v1049_v50 = vpop.f32.mrb[4].mxu0 }
 0x128   :  { %v1050_v51 = vpop.f32.mrb[5].mxu0 }
 0x129   :  { %v1051_v52 = vadd.f32 %v1050_v51, %v1049_v50  ;;  %v1052_v53 = vpop.f32.mrb[6].mxu0 }
 0x12a   :  { %v1053_v54 = vpop.f32.mrb[7].mxu0 }
 0x12b   :  { %v661_v55 = vadd.f32 %v1051_v52, %v621_v44 }
 0x12d   :  { %v701_v56 = vadd.f32 %v700_v45, %v661_v55 }
 0x12f   :  { %v706_v57 = vmax.f32 %v701_v56, 0.0 }
 0x131   :  { %v707_v58 = vpack.c.bf16 %v706_v57, %v706_v57 }
 0x133   :  { %1094 = vmatmul.mubr.bf16.vlgmr.msra.gmra.mrb[8].mxu1 %v707_v58 }
 0x206   :  { %v813_v62 = vpop.f32.mrb[8].mxu1 }
 0x207   :  { %v814_v63 = vadd.f32 %v974_v61, %v813_v62  ;;  %v1095_v0 = vpop.f32.mrb[9].mxu1 }
 0x208   :  { %v816_v1 = vpop.f32.mrb[10].mxu1 }
 0x209   :  { %v819_v2 = vmax.f32 %v814_v63, 0.0  ;;  %v1096_v3 = vpop.f32.mrb[11].mxu1 }
 0x20b   :  { %v820_v4 = vpack.c.bf16 %v819_v2, %v819_v2 }
 0x20d   :  { %1106 = vmatmul.mubr.msk.bf16.vlgmr.msra.gmra.mrb[8].mxu0 %vm860_vm2, %v820_v4 }
 0x2e0   :  { %v898_v5 = vpop.f32.mrb[8].mxu0 }
 0x2e1   :  { %v899_v6 = vadd.f32 %v983_v47, %v898_v5  ;;  %v1107_v7 = vpop.f32.mrb[9].mxu0 }
 0x2e2   :  { %v901_v8 = vpop.f32.mrb[10].mxu0 }
 0x2e3   :  { %905 = vst.msk [vmem:[#allocation5] sm:$0xff] %vm904_vm3, %v899_v6  ;;  %v1108_v9 = vpop.f32.mrb[11].mxu0 }
 0x2e4   :  { %910 = vsyncadd [#allocation4], 96  ;;  %s1245_s4 = smov [#allocation5]  }
 0x2e5   :  { %s911_s5 = sshll.u32 %s1245_s4, 4  ;;  %s912_s5 = int_to_ptr.vmem [resolvable:$true] %s911_s5 }
 0x2e6   :  { %s1213_s9 = scalar_lea.vmem %s912_s5, 32  ;;  %s1217_s10 = scalar_lea.vmem %s912_s5, 128 }
 0x2e7   :  { %p1214_p8 = scmp.ne.s32.totalorder %s912_s5, %s1213_s9  ;;  %p1218_p9 = scmp.lt.s32.totalorder %s912_s5, %s912_s5 }
 0x2e8   :  { %p1219_p10 = scmp.lt.s32.totalorder %s1217_s10, %s1213_s9 }
 0x2ea   :  { %p1220_p11 = por %p1219_p10, %p1218_p9 }
 0x2ec   :  { %p1221_p12 = pnand %p1220_p11, %p1214_p8 }
 0x2ee   :  { %1224 = shalt.err (!%p1221_p12)
}
 0x2ef   :  { %s1225_s12 = scalar_lea.hbm %s1418_s7, 32 }
 0x2f0   :  { %p1226_p13 = scmp.ne.s32.totalorder %s1418_s7, %s1225_s12  ;;  %p1229_p0 = scmp.lt.u32.totalorder %s1225_s12, %s1418_s7 }
 0x2f2   :  { %p1231_p1 = pnand %p1229_p0, %p1226_p13 }
 0x2f4   :  { %1234 = shalt.err (!%p1231_p1)
}
 0x2f5   :  { %s1246_s16 = smov 32   ;;  %s1247_s17 = smov 2  }
 0x2f6   :  { %917 = dma.vmem_to_hbm [thread:$0]  %s912_s5, 32, %s1418_s7, [#allocation4], %s1246_s16, %s1246_s16, %s1247_s17  }
 0x2f7   :  { %1237 = dma.done.wait [#allocation4], 128  }
 0x2f8   :  { %1238 = vsyncadd [#allocation4], 4294967168 }
 0x2f9   :  { %921 = vsyncpa [#allocation3], 1 }
 0x2fa   :  { %922 = vsyncpa [#allocation4], 1 }

</bundles_post_ra>
